<compile_context>
chip_gen: v7x
topology: tpu7x:2x2x1
jax: 0.10.0
libtpu: 0.0.40
codegen_flags: <defaults>
</compile_context>

<pallas_src>
import jax
import jax.numpy as jnp
from jax.experimental import pallas as pl
from jax.experimental.pallas import tpu as pltpu


def _round_up(x, m):
    return ((x + m - 1) // m) * m


def _pick_row_tile(M, row_tile):
    """Row-tile size: multiple of 8 (or == M for tiny inputs), and small enough
    that the row grid has >= 2 steps so v7x can use both TensorCores."""
    if M <= 8:
        return M
    rt = min(row_tile, _round_up(pl.cdiv(M, 2), 8))
    return max(rt, 8)


def _vmem_cap_bytes():
    """Per-generation VMEM capacity (bytes); conservative fallback = 64 MiB."""
    try:
        cap = getattr(pltpu.get_tpu_info(), "vmem_capacity_bytes", None)
        if cap:
            return int(cap)
    except Exception:
        pass
    return 64 * 1024 * 1024


def _spatial_relation_kernel(
    f_ref, p_ref,                        # inputs: features tile, points tile
    ws1_ref, bs1_ref, ws2_ref, bs2_ref,  # spatial_attention MLP params
    wp1_ref, bp1_ref, wp2_ref, bp2_ref,  # position_encoding MLP params
    o_ref,                               # output tile
):
    f = f_ref[...]                       # native dtype -> MXU (bf16-ready)

    # spatial_attention: Linear -> ReLU -> Linear   (MXU, f32 accumulation)
    h_s = jnp.dot(f, ws1_ref[...], preferred_element_type=jnp.float32)
    h_s = jnp.maximum(h_s + bs1_ref[...].astype(jnp.float32), 0.0)
    sw = jnp.dot(h_s.astype(ws2_ref.dtype), ws2_ref[...],
                 preferred_element_type=jnp.float32)
    sw = sw + bs2_ref[...].astype(jnp.float32)

    # position_encoding first layer: the K=3 contraction as 3 VPU FMAs
    # (avoids padding K=3 up to the 128/256-wide MXU).
    p = p_ref[...].astype(jnp.float32)                 # (rt, 3)
    wp1 = wp1_ref[...].astype(jnp.float32)             # (3, mid)
    h_p = (p[:, 0:1] * wp1[0:1, :]
           + p[:, 1:2] * wp1[1:2, :]
           + p[:, 2:3] * wp1[2:3, :]
           + bp1_ref[...].astype(jnp.float32))
    h_p = jnp.maximum(h_p, 0.0)
    pe = jnp.dot(h_p.astype(wp2_ref.dtype), wp2_ref[...],
                 preferred_element_type=jnp.float32)
    pe = pe + bp2_ref[...].astype(jnp.float32)

    # enhanced = features + spatial_weights * pos_encoding
    prod = sw * pe                                     # f32 (rt, C)
    o_ref[...] = (f.astype(jnp.float32) + prod).astype(o_ref.dtype)


def spatial_relation_forward(features, points, params, *, row_tile=None):
    """features: [B, N, C], points: [B, N, 3] (float32 or bfloat16)."""
    B, N, C = features.shape
    M = B * N

    (ws1, bs1, ws2, bs2, wp1, bp1, wp2, bp2) = params
    mid = ws1.shape[1]

    itemsize = jnp.dtype(features.dtype).itemsize
    if row_tile is None:
        # HBM-bound kernel: bigger tiles amortise per-step overhead; bf16
        # halves per-row bytes so the tile can be twice as tall.
        row_tile = 4096 if itemsize <= 2 else 2048

    rt = _pick_row_tile(M, row_tile)
    grid = (pl.cdiv(M, rt),)             # partial last block handled by masking

    f2 = features.reshape(M, C)
    p2 = points.reshape(M, 3)

    w_bytes = sum(int(w.size) * jnp.dtype(w.dtype).itemsize
                  for w in (ws1, bs1, ws2, bs2, wp1, bp1, wp2, bp2))
    # VMEM budget: double-buffered feature in/out + points blocks, weights
    # (double-buffered by default), and the f32 intermediates live in-kernel.
    vmem_est = (2 * 2 * rt * C * itemsize            # features in + out, 2x buffered
                + 2 * rt * 3 * itemsize              # points, 2x buffered
                + 2 * w_bytes                        # weights, 2x buffered
                + rt * (2 * mid + 3 * C) * 4)        # f32 intermediates
    # Cap at ~85% of this chip's physical VMEM (keeps headroom for Mosaic
    # scratch on v7x, doesn't strangle 128 MiB v5e/v6e parts).
    vmem_cap = int(0.85 * _vmem_cap_bytes())
    vmem_limit = int(min(max(2 * vmem_est, 32 * 1024 * 1024), vmem_cap))

    flops = int(M) * (2 * C * mid        # spatial_attention layer 1
                      + 2 * mid * C      # spatial_attention layer 2
                      + 6 * mid          # position_encoding layer 1 (FMA)
                      + 2 * mid * C      # position_encoding layer 2
                      + 3 * C)           # residual fuse
    bytes_accessed = int((2 * M * C + M * 3) * itemsize + w_bytes)
    cost = pl.CostEstimate(flops=flops, transcendentals=0,
                           bytes_accessed=bytes_accessed)

    full = lambda shape: pl.BlockSpec(shape, lambda i: (0, 0))

    out = pl.pallas_call(
        _spatial_relation_kernel,
        out_shape=jax.ShapeDtypeStruct((M, C), features.dtype),
        grid_spec=pltpu.PrefetchScalarGridSpec(
            num_scalar_prefetch=0,
            grid=grid,
            in_specs=[
                pl.BlockSpec((rt, C), lambda i: (i, 0)),   # features
                pl.BlockSpec((rt, 3), lambda i: (i, 0)),   # points
                full((C, mid)), full((1, mid)),            # ws1, bs1
                full((mid, C)), full((1, C)),              # ws2, bs2
                full((3, mid)), full((1, mid)),            # wp1, bp1
                full((mid, C)), full((1, C)),              # wp2, bp2
            ],
            out_specs=pl.BlockSpec((rt, C), lambda i: (i, 0)),
        ),
        compiler_params=pltpu.CompilerParams(
            dimension_semantics=("parallel",),
            vmem_limit_bytes=vmem_limit,
        ),
        cost_estimate=cost,
    )(f2, p2, ws1, bs1, ws2, bs2, wp1, bp1, wp2, bp2)

    return out.reshape(B, N, C)


def init_params(key, feature_dim):
    """Deterministic synthetic init (PyTorch-Linear-like uniform bounds)."""
    mid = feature_dim // 2

    def linear(k, fan_in, fan_out):
        kw, kb = jax.random.split(k)
        bound = 1.0 / jnp.sqrt(fan_in)
        w = jax.random.uniform(kw, (fan_in, fan_out), jnp.float32, -bound, bound)
        b = jax.random.uniform(kb, (1, fan_out), jnp.float32, -bound, bound)
        return w, b

    k1, k2, k3, k4 = jax.random.split(key, 4)
    ws1, bs1 = linear(k1, feature_dim, mid)   # spatial_attention[0]
    ws2, bs2 = linear(k2, mid, feature_dim)   # spatial_attention[2]
    wp1, bp1 = linear(k3, 3, mid)             # position_encoding[0]
    wp2, bp2 = linear(k4, mid, feature_dim)   # position_encoding[2]
    return (ws1, bs1, ws2, bs2, wp1, bp1, wp2, bp2)


def reference_forward(features, points, params):
    ws1, bs1, ws2, bs2, wp1, bp1, wp2, bp2 = params
    sw = jnp.maximum(features @ ws1 + bs1, 0.0) @ ws2 + bs2
    pe = jnp.maximum(points @ wp1 + bp1, 0.0) @ wp2 + bp2
    return features + sw * pe


if __name__ == "__main__":
    feature_dim = 32          # small stand-in for default 256
    B, N = 2, 16

    key = jax.random.PRNGKey(0)
    kf, kp, kw = jax.random.split(key, 3)
    features = jax.random.normal(kf, (B, N, feature_dim), jnp.float32)
    points = jax.random.normal(kp, (B, N, 3), jnp.float32)
    params = init_params(kw, feature_dim)

    out = spatial_relation_forward(features, points, params)
    out = jax.block_until_ready(out)

    ref = reference_forward(features, points, params)
    assert out.shape == (B, N, feature_dim)
    assert jnp.allclose(out, ref, atol=1e-4, rtol=1e-4), "mismatch vs reference"

    print("KERNEL_OK")
</pallas_src>

<mosaic_0001>
module attributes {stable_mosaic.version = 11 : i64} {
  func.func @_spatial_relation_kernel(%arg0: i32, %arg1: memref<16x32xf32, #tpu.memory_space<vmem>>, %arg2: memref<16x3xf32, #tpu.memory_space<vmem>>, %arg3: memref<32x16xf32, #tpu.memory_space<vmem>>, %arg4: memref<1x16xf32, #tpu.memory_space<vmem>>, %arg5: memref<16x32xf32, #tpu.memory_space<vmem>>, %arg6: memref<1x32xf32, #tpu.memory_space<vmem>>, %arg7: memref<3x16xf32, #tpu.memory_space<vmem>>, %arg8: memref<1x16xf32, #tpu.memory_space<vmem>>, %arg9: memref<16x32xf32, #tpu.memory_space<vmem>>, %arg10: memref<1x32xf32, #tpu.memory_space<vmem>>, %arg11: memref<16x32xf32, #tpu.memory_space<vmem>>) attributes {dimension_semantics = [#tpu.dimension_semantics<parallel>], iteration_bounds = array<i64: 2>, scalar_prefetch = 0 : i64, scratch_operands = 0 : i64, tpu.core_type = #tpu.core_type<tc>, window_params = [{transform_indices = @transform_0, window_bounds = array<i64: 16, 32>}, {transform_indices = @transform_1, window_bounds = array<i64: 16, 3>}, {pipeline_mode = #tpu.pipeline_mode<synchronous>, transform_indices = @transform_2, window_bounds = array<i64: 32, 16>}, {pipeline_mode = #tpu.pipeline_mode<synchronous>, transform_indices = @transform_3, window_bounds = array<i64: 1, 16>}, {pipeline_mode = #tpu.pipeline_mode<synchronous>, transform_indices = @transform_4, window_bounds = array<i64: 16, 32>}, {pipeline_mode = #tpu.pipeline_mode<synchronous>, transform_indices = @transform_5, window_bounds = array<i64: 1, 32>}, {pipeline_mode = #tpu.pipeline_mode<synchronous>, transform_indices = @transform_6, window_bounds = array<i64: 3, 16>}, {pipeline_mode = #tpu.pipeline_mode<synchronous>, transform_indices = @transform_7, window_bounds = array<i64: 1, 16>}, {pipeline_mode = #tpu.pipeline_mode<synchronous>, transform_indices = @transform_8, window_bounds = array<i64: 16, 32>}, {pipeline_mode = #tpu.pipeline_mode<synchronous>, transform_indices = @transform_9, window_bounds = array<i64: 1, 32>}, {transform_indices = @transform_10, window_bounds = array<i64: 16, 32>}]} {
    %c0 = arith.constant 0 : index
    %c0_0 = arith.constant 0 : index
    %0 = vector.load %arg1[%c0, %c0_0] : memref<16x32xf32, #tpu.memory_space<vmem>>, vector<16x32xf32>
    %c0_1 = arith.constant 0 : index
    %c0_2 = arith.constant 0 : index
    %1 = vector.load %arg3[%c0_1, %c0_2] : memref<32x16xf32, #tpu.memory_space<vmem>>, vector<32x16xf32>
    %cst = arith.constant dense<0.000000e+00> : vector<16x16xf32>
    %2 = tpu.matmul %0, %1, %cst {dimension_numbers = #tpu.dot_dimension_numbers<[1], [0], [0], [1], [0, 0, 1, 1], [], []>} : vector<16x32xf32>, vector<32x16xf32>, vector<16x16xf32> -> vector<16x16xf32>
    %c0_3 = arith.constant 0 : index
    %c0_4 = arith.constant 0 : index
    %3 = vector.load %arg4[%c0_3, %c0_4] : memref<1x16xf32, #tpu.memory_space<vmem>>, vector<1x16xf32>
    %4 = vector.broadcast %3 : vector<1x16xf32> to vector<16x16xf32>
    %5 = arith.addf %2, %4 : vector<16x16xf32>
    %cst_5 = arith.constant 0.000000e+00 : f32
    %6 = vector.broadcast %cst_5 : f32 to vector<16x16xf32>
    %7 = arith.maximumf %5, %6 : vector<16x16xf32>
    %c0_6 = arith.constant 0 : index
    %c0_7 = arith.constant 0 : index
    %8 = vector.load %arg5[%c0_6, %c0_7] : memref<16x32xf32, #tpu.memory_space<vmem>>, vector<16x32xf32>
    %cst_8 = arith.constant dense<0.000000e+00> : vector<16x32xf32>
    %9 = tpu.matmul %7, %8, %cst_8 {dimension_numbers = #tpu.dot_dimension_numbers<[1], [0], [0], [1], [0, 0, 1, 1], [], []>} : vector<16x16xf32>, vector<16x32xf32>, vector<16x32xf32> -> vector<16x32xf32>
    %c0_9 = arith.constant 0 : index
    %c0_10 = arith.constant 0 : index
    %10 = vector.load %arg6[%c0_9, %c0_10] : memref<1x32xf32, #tpu.memory_space<vmem>>, vector<1x32xf32>
    %11 = vector.broadcast %10 : vector<1x32xf32> to vector<16x32xf32>
    %12 = arith.addf %9, %11 : vector<16x32xf32>
    %c0_11 = arith.constant 0 : index
    %c0_12 = arith.constant 0 : index
    %13 = vector.load %arg2[%c0_11, %c0_12] : memref<16x3xf32, #tpu.memory_space<vmem>>, vector<16x3xf32>
    %c0_13 = arith.constant 0 : index
    %c0_14 = arith.constant 0 : index
    %14 = vector.load %arg7[%c0_13, %c0_14] : memref<3x16xf32, #tpu.memory_space<vmem>>, vector<3x16xf32>
    %15 = vector.extract_strided_slice %13 {offsets = [0, 0], sizes = [16, 1], strides = [1, 1]} : vector<16x3xf32> to vector<16x1xf32>
    %16 = vector.extract_strided_slice %14 {offsets = [0, 0], sizes = [1, 16], strides = [1, 1]} : vector<3x16xf32> to vector<1x16xf32>
    %17 = vector.broadcast %15 : vector<16x1xf32> to vector<16x16xf32>
    %18 = vector.broadcast %16 : vector<1x16xf32> to vector<16x16xf32>
    %19 = arith.mulf %17, %18 : vector<16x16xf32>
    %20 = vector.extract_strided_slice %13 {offsets = [0, 1], sizes = [16, 1], strides = [1, 1]} : vector<16x3xf32> to vector<16x1xf32>
    %21 = vector.extract_strided_slice %14 {offsets = [1, 0], sizes = [1, 16], strides = [1, 1]} : vector<3x16xf32> to vector<1x16xf32>
    %22 = vector.broadcast %20 : vector<16x1xf32> to vector<16x16xf32>
    %23 = vector.broadcast %21 : vector<1x16xf32> to vector<16x16xf32>
    %24 = arith.mulf %22, %23 : vector<16x16xf32>
    %25 = arith.addf %19, %24 : vector<16x16xf32>
    %26 = vector.extract_strided_slice %13 {offsets = [0, 2], sizes = [16, 1], strides = [1, 1]} : vector<16x3xf32> to vector<16x1xf32>
    %27 = vector.extract_strided_slice %14 {offsets = [2, 0], sizes = [1, 16], strides = [1, 1]} : vector<3x16xf32> to vector<1x16xf32>
    %28 = vector.broadcast %26 : vector<16x1xf32> to vector<16x16xf32>
    %29 = vector.broadcast %27 : vector<1x16xf32> to vector<16x16xf32>
    %30 = arith.mulf %28, %29 : vector<16x16xf32>
    %31 = arith.addf %25, %30 : vector<16x16xf32>
    %c0_15 = arith.constant 0 : index
    %c0_16 = arith.constant 0 : index
    %32 = vector.load %arg8[%c0_15, %c0_16] : memref<1x16xf32, #tpu.memory_space<vmem>>, vector<1x16xf32>
    %33 = vector.broadcast %32 : vector<1x16xf32> to vector<16x16xf32>
    %34 = arith.addf %31, %33 : vector<16x16xf32>
    %cst_17 = arith.constant 0.000000e+00 : f32
    %35 = vector.broadcast %cst_17 : f32 to vector<16x16xf32>
    %36 = arith.maximumf %34, %35 : vector<16x16xf32>
    %c0_18 = arith.constant 0 : index
    %c0_19 = arith.constant 0 : index
    %37 = vector.load %arg9[%c0_18, %c0_19] : memref<16x32xf32, #tpu.memory_space<vmem>>, vector<16x32xf32>
    %cst_20 = arith.constant dense<0.000000e+00> : vector<16x32xf32>
    %38 = tpu.matmul %36, %37, %cst_20 {dimension_numbers = #tpu.dot_dimension_numbers<[1], [0], [0], [1], [0, 0, 1, 1], [], []>} : vector<16x16xf32>, vector<16x32xf32>, vector<16x32xf32> -> vector<16x32xf32>
    %c0_21 = arith.constant 0 : index
    %c0_22 = arith.constant 0 : index
    %39 = vector.load %arg10[%c0_21, %c0_22] : memref<1x32xf32, #tpu.memory_space<vmem>>, vector<1x32xf32>
    %40 = vector.broadcast %39 : vector<1x32xf32> to vector<16x32xf32>
    %41 = arith.addf %38, %40 : vector<16x32xf32>
    %42 = arith.mulf %12, %41 : vector<16x32xf32>
    %43 = arith.addf %0, %42 : vector<16x32xf32>
    %c0_23 = arith.constant 0 : index
    %c0_24 = arith.constant 0 : index
    %44 = vector.load %arg11[%c0_23, %c0_24] : memref<16x32xf32, #tpu.memory_space<vmem>>, vector<16x32xf32>
    tpu.vector_store %arg11[%c0_23, %c0_24], %43 {strides = array<i32>} : memref<16x32xf32, #tpu.memory_space<vmem>>, vector<16x32xf32>,
    return
  }
  func.func @transform_0(%arg0: i32) -> (i32, i32) {
    %c0_i32 = arith.constant 0 : i32
    %c0_i32_0 = arith.constant 0 : i32
    return %arg0, %c0_i32 : i32, i32
  }
  func.func @transform_1(%arg0: i32) -> (i32, i32) {
    %c0_i32 = arith.constant 0 : i32
    %c0_i32_0 = arith.constant 0 : i32
    return %arg0, %c0_i32 : i32, i32
  }
  func.func @transform_2(%arg0: i32) -> (i32, i32) {
    %c0_i32 = arith.constant 0 : i32
    %c0_i32_0 = arith.constant 0 : i32
    %c0_i32_1 = arith.constant 0 : i32
    return %c0_i32, %c0_i32_0 : i32, i32
  }
  func.func @transform_3(%arg0: i32) -> (i32, i32) {
    %c0_i32 = arith.constant 0 : i32
    %c0_i32_0 = arith.constant 0 : i32
    %c0_i32_1 = arith.constant 0 : i32
    return %c0_i32, %c0_i32_0 : i32, i32
  }
  func.func @transform_4(%arg0: i32) -> (i32, i32) {
    %c0_i32 = arith.constant 0 : i32
    %c0_i32_0 = arith.constant 0 : i32
    %c0_i32_1 = arith.constant 0 : i32
    return %c0_i32, %c0_i32_0 : i32, i32
  }
  func.func @transform_5(%arg0: i32) -> (i32, i32) {
    %c0_i32 = arith.constant 0 : i32
    %c0_i32_0 = arith.constant 0 : i32
    %c0_i32_1 = arith.constant 0 : i32
    return %c0_i32, %c0_i32_0 : i32, i32
  }
  func.func @transform_6(%arg0: i32) -> (i32, i32) {
    %c0_i32 = arith.constant 0 : i32
    %c0_i32_0 = arith.constant 0 : i32
    %c0_i32_1 = arith.constant 0 : i32
    return %c0_i32, %c0_i32_0 : i32, i32
  }
  func.func @transform_7(%arg0: i32) -> (i32, i32) {
    %c0_i32 = arith.constant 0 : i32
    %c0_i32_0 = arith.constant 0 : i32
    %c0_i32_1 = arith.constant 0 : i32
    return %c0_i32, %c0_i32_0 : i32, i32
  }
  func.func @transform_8(%arg0: i32) -> (i32, i32) {
    %c0_i32 = arith.constant 0 : i32
    %c0_i32_0 = arith.constant 0 : i32
    %c0_i32_1 = arith.constant 0 : i32
    return %c0_i32, %c0_i32_0 : i32, i32
  }
  func.func @transform_9(%arg0: i32) -> (i32, i32) {
    %c0_i32 = arith.constant 0 : i32
    %c0_i32_0 = arith.constant 0 : i32
    %c0_i32_1 = arith.constant 0 : i32
    return %c0_i32, %c0_i32_0 : i32, i32
  }
  func.func @transform_10(%arg0: i32) -> (i32, i32) {
    %c0_i32 = arith.constant 0 : i32
    %c0_i32_0 = arith.constant 0 : i32
    return %arg0, %c0_i32 : i32, i32
  }
}

</mosaic_0001>

<bundles_post_ra>
// kernel: tpu_custom_call.1
= control target key start
LH: loop header
LB: loop body
LE: loop exit
PB: predicated region body
PF: predicated region fallthrough
CT: control target
= control target key end

     0   :  { %15 = vsyncpa [#allocation3], 0  ;;  %s1228_s0 = inlined_call_operand.vmem [shape: f32[32,32], index: 0, kind: input, shape index: {}]   ;;  %s1229_s1 = inlined_call_operand.vmem [shape: f32[32,3], index: 1, kind: input, shape index: {}]   ;;  %s1230_s2 = inlined_call_operand.vmem [shape: f32[32,16], index: 2, kind: input, shape index: {}]   ;;  %s1231_s3 = inlined_call_operand.vmem [shape: f32[1,16], index: 3, kind: input, shape index: {}]   ;;  %s1232_s4 = inlined_call_operand.vmem [shape: f32[16,32], index: 4, kind: input, shape index: {}]   ;;  %s1233_s5 = inlined_call_operand.vmem [shape: f32[1,32], index: 5, kind: input, shape index: {}]   ;;  %s1234_s6 = inlined_call_operand.vmem [shape: f32[3,16], index: 6, kind: input, shape index: {}]   ;;  %s1235_s7 = inlined_call_operand.vmem [shape: f32[1,16], index: 7, kind: input, shape index: {}]   ;;  %s1236_s8 = inlined_call_operand.vmem [shape: f32[16,32], index: 8, kind: input, shape index: {}]   ;;  %s1237_s9 = inlined_call_operand.vmem [shape: f32[1,32], index: 9, kind: input, shape index: {}]   ;;  %s1238_s10 = inlined_call_operand.hbm [shape: f32[32,32], index: 10, kind: output, shape index: {}]  }
   0x1   :  { %17 = vsyncpa [#allocation3 + $0x1], 0  ;;  %s1072_s13 = smov 0   ;;  %s1074_s14 = smov 0  }
   0x2   :  { %s1076_s15 = smov 0   ;;  %s1078_s16 = smov 0  }
   0x3 LB: > { %s1093_s17 = sadd.s32 4294967295, %s1009_s16   ;;  %s817_s18 = sadd.s32 4294967294, %s1009_s16   ;;  %s1009_s16 = sphi %s1078_s16, %s1244_s16   ;;  %s1005_s15 = sphi %s1076_s15, %s1243_s15   ;;  %s1001_s14 = sphi %s1074_s14, %s1242_s14   ;;  %s997_s13 = sphi %s1072_s13, %s1241_s13  }
   0x4   : > { %s1097_s19 = sadd.s32 1, %s1009_s16   ;;  %s250_s20 = sadd.s32 1, %s1005_s15 }
   0x5   : > { %s247_s21 = ssub.s32 %s1009_s16, %s1097_s19  ;;  %p260_p0 = scmp.ne.s32.totalorder %s1005_s15, %s1001_s14 }
   0x6   : > { %p248_p1 = scmp.eq.s32.totalorder %s247_s21, 0  ;;  %p261_p2 = scmp.eq.s32.totalorder %s1093_s17, 1 }
   0x7   : > { %p266_p3 = scmp.ne.s32.totalorder %s1001_s14, %s997_s13  ;;  %p267_p4 = scmp.eq.s32.totalorder %s817_s18, 1 }
   0x8   : > { %s1108_s22 = scalar_select %p248_p1, %s1005_s15, %s250_s20  }
   0x9   : > { %p1110_p5 = por %p261_p2, %p260_p0  ;;  %p1114_p6 = por %p267_p4, %p266_p3 }
   0xa   : > { %p820_p7 = scmp.ge.s32.totalorder %s1009_s16, 1  ;;  %p327_p8 = scmp.lt.s32.totalorder %s1009_s16, 3 }
   0xc   : > { %p328_p9 = pnand %p820_p7, %p327_p8 }
   0xd   : > { %v385_v0 = vld [vmem:[%s1230_s2] sm:$0xff] (!%p328_p9)  ;;  %v386_v1 = vld [vmem:[%s1230_s2 + $0x8] sm:$0xff] (!%p328_p9)  ;;  %v387_v2 = vld [vmem:[%s1230_s2 + $0x10] sm:$0xff] (!%p328_p9)  ;;  %s822_s11 = sshll.u32 (!%p328_p9), %s1093_s17, 1  ;;  %v1011_v5 = vmov (!%p328_p9), 0   ;;  %vm396_vm0 = vcmask (!%p328_p9), 261120   ;;  %v584_v19 = vlaneseq (!%p328_p9) }
   0xe   : > { %331 = sbr.rel (%p328_p9) target bundleno = 483 (0x1e3), region = 60  ;;  %v881_v3 = vpack.c.bf16 (!%p328_p9), %v386_v1, %v385_v0  ;;  %v388_v4 = vld [vmem:[%s1230_s2 + $0x18] sm:$0xff] (!%p328_p9)  ;;  %p371_p10 = scmp.lt.s32.totalorder (!%p328_p9), %s822_s11, 3  ;;  %941 = vset.pattern.permute.xlu0 (!%p328_p9), %v1011_v5  ;;  %943 = vset.pattern.permute.xlu1 (!%p328_p9), %v1011_v5  ;;  %v1012_v11 = vmov (!%p328_p9), 1   ;;  %v1013_v12 = vmov (!%p328_p9), 2   ;;  %v480_v13 = vld [vmem:[%s1232_s4] sm:$0xff] (!%p328_p9) }
   0xf   : > { %v885_v6 = vpack.c.bf16 (!%p328_p9), %v388_v4, %v387_v2  ;;  %v481_v14 = vld [vmem:[%s1232_s4 + $0x8] sm:$0xff] (!%p328_p9)  ;;  %v633_v16 = vld [vmem:[%s1236_s8] sm:$0xff] (!%p328_p9)  ;;  %v585_v20 = vshrl.u32 (!%p328_p9), %v584_v19, 7  ;;  %vm489_vm1 = vcmask (!%p328_p9), 130048   ;;  %s367_s18 = sand.u32 (!%p328_p9), 1, %s1001_s14   ;;  %s841_s28 = sshll.u32 (!%p328_p9), %s1093_s17, 8 }
  0x10   : > { %882 = vmatprep.subr.bf16.mxu0 (!%p328_p9), %v881_v3  ;;  %v889_v15 = vpack.c.bf16 (!%p328_p9), %v481_v14, %v480_v13  ;;  %v634_v17 = vld [vmem:[%s1236_s8 + $0x8] sm:$0xff] (!%p328_p9)  ;;  %v573_v25 = vld [vmem:[%s1234_s6] sm:$0x7] (!%p328_p9)  ;;  %s1180_s21 = scalar_lea.hbm (!%p328_p9), %s1238_s10, %s841_s28  ;;  %s1187_s17 = scalar_lea.sflag (!%p328_p9), [#allocation3], %s367_s18 }
  0x11   : > { %884 = vmatpush3.bf16.msra.mxu0 (!%p328_p9), %v881_v3  ;;  %v893_v18 = vpack.c.bf16 (!%p328_p9), %v634_v17, %v633_v16  ;;  %v586_v22 = vsub.s32 (!%p328_p9), 0, %v585_v20  ;;  %v600_v24 = vsub.s32 (!%p328_p9), 1, %v585_v20  ;;  %v616_v29 = vsub.s32 (!%p328_p9), 2, %v585_v20  ;;  %v826_v43 = vld [vmem:[%s1231_s3] ss:$0 sm:$0xff] (!%p328_p9)  ;;  %s1014_s25 = smov (!%p328_p9), [#allocation2]  }
  0x12   : > { %886 = vmatprep.subr.bf16.mxu0 (!%p328_p9), %v885_v6  ;;  %890 = vmatprep.subr.bf16.mxu1 (!%p328_p9), %v889_v15  ;;  %v832_v44 = vld [vmem:[%s1235_s7] ss:$0 sm:$0xff] (!%p328_p9) }
  0x13   : > { %892 = vmatpush3.bf16.msra.mxu1 (!%p328_p9), %v889_v15  ;;  %v587_v27 = vrot.slane (!%p328_p9), %v573_v25, %v586_v22  ;;  %v601_v28 = vrot.slane (!%p328_p9), %v573_v25, %v600_v24  ;;  %v617_v33 = vrot.slane (!%p328_p9), %v573_v25, %v616_v29  ;;  %v829_v58 = vld [vmem:[%s1233_s5] ss:$0 sm:$0xff] (!%p328_p9) }
  0x14   : > { %894 = vmatprep.subr.bf16.mxu1 (!%p328_p9), %v893_v18  ;;  %v833_v59 = vld [vmem:[%s1237_s9] ss:$0 sm:$0xff] (!%p328_p9) }
  0x15   : > { %s1246_s11 = smov (!%p371_p10, %s822_s11), 3  ;;  %888 = vmatpush3.bf16.msra.mxu0 %v885_v6 }
  0x16   : > { %s823_s20 = sshll.u32 %s1246_s11, 3 }
  0x17   : > { %s374_s26 = scalar_lea.vmem %s1228_s0, %s823_s20  ;;  %s380_s29 = scalar_lea.vmem %s1229_s1, %s823_s20 }
  0x18   : > { %v1139_v7 = vld [vmem:[%s374_s26] sm:$0xff]  ;;  %v1141_v9 = vld [vmem:[%s374_s26 + $0x8] sm:$0xff]  ;;  %s821_s20 = sshll.u32 %s367_s18, 4  ;;  %s951_s26 = sshll.u32 %s1014_s25, 4  ;;  %s952_s26 = int_to_ptr.vmem [resolvable:$false] %s951_s26 }
  0x19   : > { %v571_v8 = vld [vmem:[%s380_s29] sm:$0xff]  ;;  %864 = vmatprep.mubr.msk.f32.mxu0 %vm396_vm0, %v1139_v7  ;;  %v572_v10 = vld [vmem:[%s380_s29 + $0x8] sm:$0xff]  ;;  %s369_s29 = scalar_lea.vmem [#allocation2], %s821_s20  ;;  %s953_s27 = scalar_lea.vmem %s952_s26, 512 }
  0x1a   : > { %576 = vperm.xlu0 %941, %v571_v8   ;;  %581 = vperm.xlu1 %943, %v572_v10   ;;  %s743_s30 = sshll.u32 %s369_s29, 4  ;;  %s1182_s30 = int_to_ptr.vmem [resolvable:$true] %s743_s30 }
  0x1b   : > { %865 = vmatmul.mubr.msk.f32.vlgmr.msra.gmra.mrb[0].mxu0 %vm396_vm0, %v1141_v9  ;;  %s947_s20 = scalar_lea.vmem %s1182_s30, 256  ;;  %p954_p0 = scmp.lt.s32.totalorder %s1182_s30, %s952_s26 }
  0x1c   : > { %p948_p11 = scmp.ne.s32.totalorder %s1182_s30, %s947_s20  ;;  %p955_p1 = scmp.lt.s32.totalorder %s953_s27, %s947_s20 }
  0x1e   : > { %942 = vset.pattern.permute.xlu0 %v1012_v11  ;;  %944 = vset.pattern.permute.xlu1 %v1012_v11  ;;  %p949_p12 = pnand %p948_p11, %p1110_p5  ;;  %p956_p2 = por %p955_p1, %p954_p0 }
  0x1f   : > { %591 = vperm.xlu0 %942, %v571_v8   ;;  %595 = vperm.xlu1 %944, %v572_v10  }
  0x20   : > { %p950_p13 = pneg %p949_p12 }
  0x22   : > { %p957_p3 = pnand %p956_p2, %p950_p13 }
  0x23   : > { %946 = vset.pattern.permute.xlu0 %v1013_v12  ;;  %945 = vset.pattern.permute.xlu1 %v1013_v12 }
  0x24   : > { %611 = vperm.xlu0 %946, %v572_v10   ;;  %607 = vperm.xlu1 %945, %v571_v8  }
  0x99   : > { %v582_v21 = vpop.permute.xlu1 %581  ;;  %v577_v23 = vpop.permute.xlu0 %576 }
  0x9a   : > { %v588_v31 = vmul.f32 %v587_v27, %v577_v23  ;;  %v589_v35 = vmul.f32 %v587_v27, %v582_v21 }
  0x9e   : > { %v596_v26 = vpop.permute.xlu1 %595  ;;  %v592_v30 = vpop.permute.xlu0 %591 }
  0x9f   : > { %v602_v32 = vmul.f32 %v601_v28, %v592_v30  ;;  %v603_v36 = vmul.f32 %v601_v28, %v596_v26 }
  0xa1   : > { %v604_v37 = vadd.f32 %v602_v32, %v588_v31  ;;  %v605_v40 = vadd.f32 %v603_v36, %v589_v35 }
  0xa3   : > { %v608_v34 = vpop.permute.xlu1 %607  ;;  %v612_v38 = vpop.permute.xlu0 %611 }
  0xa4   : > { %v618_v39 = vmul.f32 %v617_v33, %v608_v34  ;;  %v619_v41 = vmul.f32 %v617_v33, %v612_v38 }
  0xa6   : > { %v620_v42 = vadd.f32 %v618_v39, %v604_v37  ;;  %v621_v46 = vadd.f32 %v619_v41, %v605_v40 }
  0xa8   : > { %v629_v49 = vadd.f32 %v832_v44, %v620_v42  ;;  %v630_v52 = vadd.f32 %v832_v44, %v621_v46 }
  0xaa   : > { %v631_v54 = vmax.f32 %v629_v49, 0.0  ;;  %v632_v55 = vmax.f32 %v630_v52, 0.0 }
  0xee   : > { %v866_v45 = vpop.f32.mrb[0].mxu0 }
  0xef   : > { %v475_v47 = vadd.f32 %v866_v45, %v826_v43  ;;  %v469_v48 = vpop.f32.mrb[1].mxu0 }
  0xf0   : > { %v470_v50 = vadd.f32 %v826_v43, %v469_v48 }
  0xf1   : > { %v479_v53 = vmax.f32 %v475_v47, 0.0 }
  0xf2   : > { %v478_v51 = vmax.f32 %v470_v50, 0.0 }
  0xf4   : > { %871 = vmatprep.mubr.msk.f32.mxu1 %vm489_vm1, %v478_v51 }
  0xf5   : > { %872 = vmatmul.mubr.msk.f32.vlgmr.msra.gmra.mrb[0].mxu1 %vm489_vm1, %v479_v53 }
  0xf6   : > { %896 = vmatpush3.bf16.msra.mxu1 %v893_v18  ;;  %878 = vmatprep.mubr.msk.f32.mxu1 %vm489_vm1, %v631_v54 }
  0xf9   : > { %879 = vmatmul.mubr.msk.f32.vlgmr.msra.gmra.mrb[2].mxu1 %vm489_vm1, %v632_v55 }
 0x1c8   : > { %v873_v56 = vpop.f32.mrb[0].mxu1 }
 0x1c9   : > { %v562_v57 = vpop.f32.mrb[1].mxu1  ;;  %v568_v61 = vadd.f32 %v873_v56, %v829_v58 }
 0x1ca   : > { %v563_v0 = vadd.f32 %v829_v58, %v562_v57 }
 0x1cc   : > { %v880_v60 = vpop.f32.mrb[2].mxu1 }
 0x1cd   : > { %v720_v62 = vadd.f32 %v880_v60, %v833_v59  ;;  %v714_v63 = vpop.f32.mrb[3].mxu1 }
 0x1ce   : > { %v715_v1 = vadd.f32 %v833_v59, %v714_v63 }
 0x1cf   : > { %v724_v2 = vmul.f32 %v720_v62, %v568_v61 }
 0x1d0   : > { %v723_v3 = vmul.f32 %v715_v1, %v563_v0 }
 0x1d1   : > { %v726_v4 = vadd.f32 %v724_v2, %v1141_v9 }
 0x1d2   : > { %v725_v5 = vadd.f32 %v723_v3, %v1139_v7 }
 0x1d3   : > { %728 = vst.msk [vmem:[%s369_s29 + $0x8] sm:$0xff] %vm396_vm0, %v726_v4 }
 0x1d4   : > { %727 = vst.msk [vmem:[%s369_s29] sm:$0xff] %vm396_vm0, %v725_v5 }
 0x1d5   : > { %960 = shalt.err (!%p957_p3)
}
 0x1d6   : > { %s961_s18 = scalar_lea.hbm %s1180_s21, 256  ;;  %s965_s11 = scalar_lea.hbm %s1238_s10, 512 }
 0x1d7   : > { %p962_p4 = scmp.ne.s32.totalorder %s1180_s21, %s961_s18  ;;  %p966_p9 = scmp.lt.u32.totalorder %s1180_s21, %s1238_s10 }
 0x1d8   : > { %p967_p10 = scmp.lt.u32.totalorder %s965_s11, %s961_s18  ;;  %p969_p12 = scmp.lt.u32.totalorder %s961_s18, %s1180_s21 }
 0x1d9   : > { %p963_p7 = pnand %p962_p4, %p1110_p5 }
 0x1da   : > { %p968_p11 = por %p967_p10, %p966_p9 }
 0x1db   : > { %p964_p8 = pneg %p963_p7 }
 0x1dc   : > { %p970_p13 = por %p969_p12, %p968_p11 }
 0x1de   : > { %p971_p0 = pnand %p970_p13, %p964_p8 }
 0x1e0   : > { %974 = shalt.err (!%p971_p0)
}
 0x1e1   : > { %s1015_s20 = smov 128   ;;  %s1016_s26 = smov 8  }
 0x1e2   : > { %897 = dma.vmem_to_hbm [thread:$0]  (%p1110_p5), %s1182_s30, 256, %s1180_s21, %s1187_s17, %s1015_s20, %s1015_s20, %s1016_s26  }
 0x1e3 PF: > { %p903_p1 = scmp.ge.s32.totalorder %s1009_s16, 2  ;;  %s758_s27 = sand.u32 1, %s997_s13  }
 0x1e4   : > { %s759_s18 = scalar_lea.sflag [#allocation3], %s758_s27 }
 0x1e5   : > { %p900_p2 = pnand %p903_p1, %p1114_p6 }
 0x1e7   : > { %992 = dma.done.wait (!%p900_p2), %s759_s18, 256  }
 0x1e8   : > { %994 = vsyncadd (!%p900_p2), %s759_s18, 4294967040  ;;  %p20_p3 = scmp.ge.s32.totalorder %s1097_s19, 4   ;;  %s1241_s13 = smov %s1001_s14 }
 0x1e9   : > { %s1242_s14 = smov %s1005_s15  ;;  %s1243_s15 = smov %s1108_s22 }
 0x1ea   : > { %s1244_s16 = smov %s1097_s19  ;;  %22 = sbr.rel (!%p20_p3) target bundleno = 3 (0x3), region = 98 }
 0x1f1   :  { %764 = vsyncpa [#allocation3], 1 }
 0x1f2   :  { %766 = vsyncpa [#allocation3 + $0x1], 1 }

</bundles_post_ra>
